<compile_context>
chip_gen: v7x
topology: tpu7x:2x2x1
jax: 0.10.0
libtpu: 0.0.40
codegen_flags: <defaults>
</compile_context>

<pallas_src>
import functools

import jax
import jax.numpy as jnp
from jax.experimental import pallas as pl
from jax.experimental.pallas import tpu as pltpu


_TM_MAX = 512        # max frames (output rows) per grid step
_OVERLAP_ROWS = 16   # bf16-tile-aligned overlap window into the next tile (need n_chunks-1 <= 16)
_LANE = 128


def _round_up(x, m):
    return ((x + m - 1) // m) * m


# ---------------------------------------------------------------------------
# Parameter construction (deterministic, mirrors the PyTorch __init__).
# ---------------------------------------------------------------------------
def hann_window_periodic(win_length):
    # torch.hann_window(win_length, periodic=True)
    n = jnp.arange(win_length, dtype=jnp.float32)
    return 0.5 - 0.5 * jnp.cos(2.0 * jnp.pi * n / win_length)


def make_fourier_basis(n_fft, win_length, window):
    """Returns (W_real, W_imag), each (n_fft, freq_cutoff) float32.

    Matches: view_as_real(fft(eye(n_fft), dim=1))[:freq_cutoff] scaled by
             librosa.util.pad_center(window, n_fft).
    """
    freq_cutoff = n_fft // 2 + 1
    lpad = (n_fft - win_length) // 2
    rpad = n_fft - win_length - lpad
    w_padded = jnp.pad(window, (lpad, rpad))                        # (n_fft,)

    n = jnp.arange(n_fft, dtype=jnp.float32)
    f = jnp.arange(freq_cutoff, dtype=jnp.float32)
    ang = 2.0 * jnp.pi * f[:, None] * n[None, :] / float(n_fft)     # (F, K)
    w_real = (jnp.cos(ang) * w_padded[None, :]).T                   # (K, F)
    w_imag = (-jnp.sin(ang) * w_padded[None, :]).T
    return w_real.astype(jnp.float32), w_imag.astype(jnp.float32)


def make_kernel_weights(w_real, w_imag, n_fft, hop_length):
    """Fused [real|imag] basis, K padded to n_chunks*hop rows: (640, 2*F_pad) bf16."""
    K, F = w_real.shape
    f_pad = _round_up(F, _LANE)                                     # 384 for n_fft=512
    w = jnp.zeros((K, 2 * f_pad), jnp.float32)
    w = w.at[:, :F].set(w_real)
    w = w.at[:, f_pad:f_pad + F].set(w_imag)
    n_chunks = -(-n_fft // hop_length)                              # ceil(n_fft / hop)
    # Zero rows for k >= n_fft: samples read from the next hop rows contribute nothing.
    w_ext = jnp.pad(w, ((0, n_chunks * hop_length - K), (0, 0)))    # (n_chunks*hop, 2*f_pad)
    return w_ext.astype(jnp.bfloat16)


# ---------------------------------------------------------------------------
# Pallas kernel: one TM-frame tile of the magnitude spectrogram.
# ---------------------------------------------------------------------------
def _stft_mag_kernel(s_main_ref, s_next_ref, w_ref, out_ref, lhs_ref,
                     *, n_chunks, hop, f_pad, tm):
    # Hop-sized signal rows for this tile plus the 16-row overlap into the next tile.
    s_all = jnp.concatenate([s_main_ref[0], s_next_ref[0]], axis=0)   # (TM+16, hop) bf16

    # One-time LHS assembly (polyphase): frame t, sample k = q*hop + r  ->  S[t+q, r].
    # The sublane shifts are paid once here instead of on every matmul operand.
    for q in range(n_chunks):
        lhs_ref[:, q * hop:(q + 1) * hop] = s_all[q:q + tm, :]

    # Single K = n_chunks*hop MXU pass with f32 accumulation.
    acc = jnp.dot(lhs_ref[...], w_ref[...],
                  preferred_element_type=jnp.float32)                 # (TM, 2*F_pad) f32

    real = acc[:, :f_pad]
    imag = acc[:, f_pad:]
    out_ref[0] = jnp.sqrt(real * real + imag * imag)                  # (TM, F_pad) f32


# ---------------------------------------------------------------------------
# Tile-size selection.
# ---------------------------------------------------------------------------
def _pick_tm(batch, t_out):
    """Largest power-of-two tile <= _TM_MAX that (a) doesn't grossly over-pad short
    signals and (b) leaves >= 2 parallel grid points when possible (v7x megacore)."""
    tm = _TM_MAX
    while tm > _OVERLAP_ROWS and (
            _round_up(t_out, _OVERLAP_ROWS) <= tm // 2
            or batch * pl.cdiv(t_out, tm) < 2):
        tm //= 2
    assert tm % _OVERLAP_ROWS == 0
    return tm


# ---------------------------------------------------------------------------
# Forward pass.
# ---------------------------------------------------------------------------
@functools.partial(jax.jit, static_argnames=("n_fft", "hop_length"))
def stft_forward(signal, w_fused, *, n_fft, hop_length):
    """signal: (B, L) f32, w_fused: (n_chunks*hop, 2*F_pad) bf16 -> (B, F, T) f32."""
    B, L = signal.shape
    F = n_fft // 2 + 1
    k_ext, two_f_pad = w_fused.shape
    f_pad = two_f_pad // 2
    n_chunks = k_ext // hop_length
    assert n_chunks * hop_length == k_ext and k_ext >= n_fft
    assert n_chunks - 1 <= _OVERLAP_ROWS

    pad = n_fft // 2                                   # == freq_cutoff - 1 == 256 here
    padded = jnp.pad(signal, ((0, 0), (pad, pad)), mode="reflect")
    L_pad = padded.shape[1]
    t_out = (L_pad - n_fft) // hop_length + 1

    tm = _pick_tm(B, t_out)
    n_tiles = pl.cdiv(t_out, tm)
    # One extra zero tile so both BlockSpec views tile the array evenly and the last
    # tile's 16-row overlap read stays in bounds; the zero rows only ever meet zero
    # rows of the extended basis (or are cropped), so they contribute nothing.
    # NOTE: do NOT drop this pad — the overlap BlockSpec reads rows [n_tiles*tm,
    # n_tiles*tm + _OVERLAP_ROWS).
    t_rows = (n_tiles + 1) * tm
    assert t_rows * hop_length >= L_pad
    # TODO(synk): signal is quantized to bf16 for the MXU path (~1e-3 relative error in
    # magnitudes); keep f32 + hi/lo bf16 split if higher fidelity is ever required.
    sig = jnp.pad(padded.astype(jnp.bfloat16),
                  ((0, 0), (0, t_rows * hop_length - L_pad)))
    sig = sig.reshape(B, t_rows, hop_length)

    kernel = functools.partial(_stft_mag_kernel,
                               n_chunks=n_chunks, hop=hop_length, f_pad=f_pad, tm=tm)
    out = pl.pallas_call(
        kernel,
        out_shape=jax.ShapeDtypeStruct((B, n_tiles * tm, f_pad), jnp.float32),
        grid=(B, n_tiles),
        in_specs=[
            # TM signal rows of this tile (streamed, double-buffered).
            pl.BlockSpec((1, tm, hop_length), lambda b, i: (b, i, 0)),
            # First 16 rows of the next tile: overlap needed by the shifted chunks.
            pl.BlockSpec((1, _OVERLAP_ROWS, hop_length),
                         lambda b, i: (b, (i + 1) * (tm // _OVERLAP_ROWS), 0)),
            # Fused [real|imag] polyphase basis: constant block -> VMEM-resident.
            pl.BlockSpec((k_ext, two_f_pad), lambda b, i: (0, 0)),
        ],
        out_specs=pl.BlockSpec((1, tm, f_pad), lambda b, i: (b, i, 0)),
        scratch_shapes=[pltpu.VMEM((tm, k_ext), jnp.bfloat16)],   # assembled LHS
        compiler_params=pltpu.CompilerParams(
            dimension_semantics=("parallel", "parallel")),
    )(sig, sig, w_fused)

    # TODO(synk): F=257 and T_out are not layout-aligned, so the final crop +
    # (B, T, F) -> (B, F, T) transpose remains a small wrapper XLA pass (kept f32 to
    # match the torch module; cast to bf16 here if the consumer allows, v6e is
    # output-HBM-bound).
    return jnp.transpose(out[:, :t_out, :F], (0, 2, 1))


# ---------------------------------------------------------------------------
# Main
# ---------------------------------------------------------------------------
if __name__ == "__main__":
    # Module hyperparameters (freq_cutoff - 1 == 256 matches the module's pad).
    n_fft = 512
    win_length = 400
    hop_length = 160
    F = n_fft // 2 + 1

    window = hann_window_periodic(win_length)
    w_real, w_imag = make_fourier_basis(n_fft, win_length, window)       # (512, 257) f32
    w_fused = make_kernel_weights(w_real, w_imag, n_fft, hop_length)     # (640, 768) bf16

    # Deterministic input: batch=2, signal length=1024 (> 256 so reflect pad is valid).
    key = jax.random.PRNGKey(0)
    signal = jax.random.normal(key, (2, 1024), dtype=jnp.float32)

    out = stft_forward(signal, w_fused, n_fft=n_fft, hop_length=hop_length)
    out = jax.block_until_ready(out)

    # Pure-JAX f32 reference of the full forward pass.
    pad = n_fft // 2
    padded = jnp.pad(signal, ((0, 0), (pad, pad)), mode="reflect")
    t_out = (padded.shape[1] - n_fft) // hop_length + 1
    idx = jnp.arange(t_out)[:, None] * hop_length + jnp.arange(n_fft)[None, :]
    frames = padded[:, idx]                                              # (B, T, 512)
    real = jnp.einsum("btk,kf->btf", frames, w_real,
                      precision=jax.lax.Precision.HIGHEST)
    imag = jnp.einsum("btk,kf->btf", frames, w_imag,
                      precision=jax.lax.Precision.HIGHEST)
    ref = jnp.transpose(jnp.sqrt(real * real + imag * imag), (0, 2, 1))  # (B, F, T)

    assert out.shape == (2, F, t_out), out.shape
    max_err = float(jnp.max(jnp.abs(out - ref)))
    # bf16 inputs / f32 accumulation: allow ~1% relative error vs the f32 reference.
    assert jnp.allclose(out, ref, rtol=3e-2, atol=3e-1), f"mismatch, max abs err {max_err}"

    print("KERNEL_OK")
</pallas_src>

<mosaic_0001>
module attributes {stable_mosaic.version = 11 : i64} {
  func.func @_stft_mag_kernel(%arg0: i32, %arg1: i32, %arg2: memref<1x16x160xbf16, #tpu.memory_space<vmem>>, %arg3: memref<1x16x160xbf16, #tpu.memory_space<vmem>>, %arg4: memref<640x768xbf16, #tpu.memory_space<vmem>>, %arg5: memref<1x16x384xf32, #tpu.memory_space<vmem>>, %arg6: memref<16x640xbf16, #tpu.memory_space<vmem>>) attributes {dimension_semantics = [#tpu.dimension_semantics<parallel>, #tpu.dimension_semantics<parallel>], iteration_bounds = array<i64: 2, 1>, scalar_prefetch = 0 : i64, scratch_operands = 1 : i64, tpu.core_type = #tpu.core_type<tc>, window_params = [{transform_indices = @transform_0, window_bounds = array<i64: 1, 16, 160>}, {transform_indices = @transform_1, window_bounds = array<i64: 1, 16, 160>}, {pipeline_mode = #tpu.pipeline_mode<synchronous>, transform_indices = @transform_2, window_bounds = array<i64: 640, 768>}, {transform_indices = @transform_3, window_bounds = array<i64: 1, 16, 384>}]} {
    %c0 = arith.constant 0 : index
    %c0_0 = arith.constant 0 : index
    %c0_1 = arith.constant 0 : index
    %0 = vector.load %arg2[%c0, %c0_0, %c0_1] : memref<1x16x160xbf16, #tpu.memory_space<vmem>>, vector<1x16x160xbf16>
    %1 = vector.shape_cast %0 : vector<1x16x160xbf16> to vector<16x160xbf16>
    %c0_2 = arith.constant 0 : index
    %c0_3 = arith.constant 0 : index
    %c0_4 = arith.constant 0 : index
    %2 = vector.load %arg3[%c0_2, %c0_3, %c0_4] : memref<1x16x160xbf16, #tpu.memory_space<vmem>>, vector<1x16x160xbf16>
    %3 = vector.shape_cast %2 : vector<1x16x160xbf16> to vector<16x160xbf16>
    %4 = tpu.concatenate %1, %3 in 0 : vector<16x160xbf16>, vector<16x160xbf16> -> vector<32x160xbf16>
    %5 = vector.extract_strided_slice %4 {offsets = [0, 0], sizes = [16, 160], strides = [1, 1]} : vector<32x160xbf16> to vector<16x160xbf16>
    %c0_5 = arith.constant 0 : index
    %c0_6 = arith.constant 0 : index
    %6 = vector.load %arg6[%c0_5, %c0_6] : memref<16x640xbf16, #tpu.memory_space<vmem>>, vector<16x160xbf16>
    tpu.vector_store %arg6[%c0_5, %c0_6], %5 {strides = array<i32>} : memref<16x640xbf16, #tpu.memory_space<vmem>>, vector<16x160xbf16>,
    %7 = vector.extract_strided_slice %4 {offsets = [1, 0], sizes = [16, 160], strides = [1, 1]} : vector<32x160xbf16> to vector<16x160xbf16>
    %c0_7 = arith.constant 0 : index
    %c160 = arith.constant 160 : index
    %8 = vector.load %arg6[%c0_7, %c160] : memref<16x640xbf16, #tpu.memory_space<vmem>>, vector<16x160xbf16>
    tpu.vector_store %arg6[%c0_7, %c160], %7 {strides = array<i32>} : memref<16x640xbf16, #tpu.memory_space<vmem>>, vector<16x160xbf16>,
    %9 = vector.extract_strided_slice %4 {offsets = [2, 0], sizes = [16, 160], strides = [1, 1]} : vector<32x160xbf16> to vector<16x160xbf16>
    %c0_8 = arith.constant 0 : index
    %c320 = arith.constant 320 : index
    %10 = vector.load %arg6[%c0_8, %c320] : memref<16x640xbf16, #tpu.memory_space<vmem>>, vector<16x160xbf16>
    tpu.vector_store %arg6[%c0_8, %c320], %9 {strides = array<i32>} : memref<16x640xbf16, #tpu.memory_space<vmem>>, vector<16x160xbf16>,
    %11 = vector.extract_strided_slice %4 {offsets = [3, 0], sizes = [16, 160], strides = [1, 1]} : vector<32x160xbf16> to vector<16x160xbf16>
    %c0_9 = arith.constant 0 : index
    %c480 = arith.constant 480 : index
    %12 = vector.load %arg6[%c0_9, %c480] : memref<16x640xbf16, #tpu.memory_space<vmem>>, vector<16x160xbf16>
    tpu.vector_store %arg6[%c0_9, %c480], %11 {strides = array<i32>} : memref<16x640xbf16, #tpu.memory_space<vmem>>, vector<16x160xbf16>,
    %c0_10 = arith.constant 0 : index
    %c0_11 = arith.constant 0 : index
    %13 = vector.load %arg6[%c0_10, %c0_11] : memref<16x640xbf16, #tpu.memory_space<vmem>>, vector<16x640xbf16>
    %c0_12 = arith.constant 0 : index
    %c0_13 = arith.constant 0 : index
    %14 = vector.load %arg4[%c0_12, %c0_13] : memref<640x768xbf16, #tpu.memory_space<vmem>>, vector<640x768xbf16>
    %cst = arith.constant dense<0.000000e+00> : vector<16x768xf32>
    %15 = tpu.matmul %13, %14, %cst {dimension_numbers = #tpu.dot_dimension_numbers<[1], [0], [0], [1], [0, 0, 1, 1], [], []>} : vector<16x640xbf16>, vector<640x768xbf16>, vector<16x768xf32> -> vector<16x768xf32>
    %16 = vector.extract_strided_slice %15 {offsets = [0, 0], sizes = [16, 384], strides = [1, 1]} : vector<16x768xf32> to vector<16x384xf32>
    %17 = vector.extract_strided_slice %15 {offsets = [0, 384], sizes = [16, 384], strides = [1, 1]} : vector<16x768xf32> to vector<16x384xf32>
    %18 = arith.mulf %16, %16 : vector<16x384xf32>
    %19 = arith.mulf %17, %17 : vector<16x384xf32>
    %20 = arith.addf %18, %19 : vector<16x384xf32>
    %21 = math.sqrt %20 : vector<16x384xf32>
    %c0_14 = arith.constant 0 : index
    %c0_15 = arith.constant 0 : index
    %c0_16 = arith.constant 0 : index
    %22 = vector.load %arg5[%c0_14, %c0_15, %c0_16] : memref<1x16x384xf32, #tpu.memory_space<vmem>>, vector<1x16x384xf32>
    %23 = vector.shape_cast %22 : vector<1x16x384xf32> to vector<16x384xf32>
    %24 = vector.shape_cast %21 : vector<16x384xf32> to vector<1x16x384xf32>
    tpu.vector_store %arg5[%c0_14, %c0_15, %c0_16], %24 {strides = array<i32>} : memref<1x16x384xf32, #tpu.memory_space<vmem>>, vector<1x16x384xf32>,
    return
  }
  func.func @transform_0(%arg0: i32, %arg1: i32) -> (i32, i32, i32) {
    %c0_i32 = arith.constant 0 : i32
    %c0_i32_0 = arith.constant 0 : i32
    return %arg0, %arg1, %c0_i32 : i32, i32, i32
  }
  func.func @transform_1(%arg0: i32, %arg1: i32) -> (i32, i32, i32) {
    %c1_i32 = arith.constant 1 : i32
    %0 = arith.addi %arg1, %c1_i32 : i32
    %c1_i32_0 = arith.constant 1 : i32
    %1 = arith.muli %0, %c1_i32_0 : i32
    %c0_i32 = arith.constant 0 : i32
    %c0_i32_1 = arith.constant 0 : i32
    return %arg0, %1, %c0_i32 : i32, i32, i32
  }
  func.func @transform_2(%arg0: i32, %arg1: i32) -> (i32, i32) {
    %c0_i32 = arith.constant 0 : i32
    %c0_i32_0 = arith.constant 0 : i32
    %c0_i32_1 = arith.constant 0 : i32
    return %c0_i32, %c0_i32_0 : i32, i32
  }
  func.func @transform_3(%arg0: i32, %arg1: i32) -> (i32, i32, i32) {
    %c0_i32 = arith.constant 0 : i32
    %c0_i32_0 = arith.constant 0 : i32
    return %arg0, %arg1, %c0_i32 : i32, i32, i32
  }
}

</mosaic_0001>

<bundles_post_ra>
// kernel: stft_forward.1
= control target key start
LH: loop header
LB: loop body
LE: loop exit
PB: predicated region body
PF: predicated region fallthrough
CT: control target
= control target key end

     0   :  { %8 = vsyncpa [#allocation4], 0  ;;  %s3204_s12 = smov 0   ;;  %s3206_s13 = smov 0   ;;  %s3339_s0 = inlined_call_operand.vmem [shape: bf16[2,32,160], index: 0, kind: input, shape index: {}, may-alias: {0,1}]   ;;  %s3340_s1 = inlined_call_operand.vmem [shape: bf16[2,32,160], index: 1, kind: input, shape index: {}, may-alias: {0,1}]   ;;  %s3341_s2 = inlined_call_operand.hbm [shape: bf16[640,768], index: 2, kind: input, shape index: {}]   ;;  %s3342_s3 = inlined_call_operand.vmem [shape: f32[2,16,384], index: 3, kind: output, shape index: {}]  }
   0x1   :  { %s3208_s14 = smov 0  }
   0x2 LB: > { %s2415_s15 = sadd.s32 4294967295, %s3175_s14   ;;  %s26_s16 = sadd.s32 1, %s3171_s13  ;;  %s3175_s14 = sphi %s3208_s14, %s14_s14   ;;  %s3171_s13 = sphi %s3206_s13, %s3352_s13   ;;  %s3167_s12 = sphi %s3204_s12, %s3351_s12  }
   0x3   : > { %p28_p0 = scmp.ge.s32.totalorder %s26_s16, 2  ;;  %p2417_p1 = scmp.ge.s32.totalorder %s3175_s14, 1 }
   0x4   : > { %p138_p2 = scmp.lt.s32.totalorder %s3175_s14, 3  ;;  %p3229_p4 = scmp.eq.s32.totalorder %s2415_s15, 0 }
   0x5   : > { %s3354_s16 = smov (%p28_p0, %s26_s16), 0  ;;  %s3177_s19 = smov [#allocation3]  }
   0x6   : > { %p3225_p3 = pnand %p2417_p1, %p138_p2  ;;  %s150_s20 = sshll.u32 %s3177_s19, 4  ;;  %s151_s20 = int_to_ptr.vmem [resolvable:$true] %s150_s20 }
   0x7   : > { %s3347_s18 = scalar_select %p3229_p4, 1, 0 }
   0x8   : > { %s3346_s17 = scalar_select %p3225_p3, 1, 0 }
   0x9   : > { %p2706_p5 = pneg %p3225_p3  ;;  %s3121_s24 = scalar_lea.hbm %s3341_s2, 30720 }
   0xa   : > { %p3122_p7 = scmp.ne.s32.totalorder %s3341_s2, %s3121_s24  ;;  %p3128_p11 = scmp.lt.u32.totalorder %s3121_s24, %s3341_s2 }
   0xb   : > { %p3237_p6 = pnand %p3229_p4, %p2706_p5 }
   0xd   : > { %p3123_p8 = pneg %p3237_p6 }
   0xf   : > { %p3124_p9 = pnand %p3123_p8, %p3122_p7 }
  0x11   : > { %p3125_p10 = pneg %p3124_p9 }
  0x13   : > { %p3130_p12 = pnand %p3128_p11, %p3125_p10 }
  0x15   : > { %3133 = shalt.err (!%p3130_p12)
}
  0x16   : > { %s3134_s29 = scalar_lea.vmem %s151_s20, 30720  ;;  %p3142_p2 = scmp.lt.s32.totalorder %s151_s20, %s151_s20 }
  0x17   : > { %p3135_p13 = scmp.ne.s32.totalorder %s151_s20, %s3134_s29  ;;  %p3143_p5 = scmp.lt.s32.totalorder %s3134_s29, %s3134_s29 }
  0x19   : > { %p3137_p0 = pnand %p3135_p13, %p3123_p8  ;;  %p3144_p4 = por %p3143_p5, %p3142_p2 }
  0x1b   : > { %p3138_p1 = pneg %p3137_p0 }
  0x1d   : > { %p3145_p3 = pnand %p3144_p4, %p3138_p1 }
  0x1f   : > { %3148 = shalt.err (!%p3145_p3)
}
  0x20   : > { %s3178_s30 = smov 384   ;;  %s3179_s4 = smov 24  }
  0x21   : > { %2709 = dma.hbm_to_vmem [thread:$0]  (!%p3237_p6), %s3341_s2, 30720, %s151_s20, [#allocation4], %s3178_s30, %s3178_s30, %s3179_s4  }
  0x22   : > { %p3349_p7 = scmp.ne.s32.totalorder %s3346_s17, 0 }
  0x23   : > { %p3350_p9 = scmp.ne.s32.totalorder (!%p3349_p7), %s3347_s18, 0 }
  0x24   : > { %196 = sbr.rel (%p3349_p7) target bundleno = 614 (0x266), region = 32 }
  0x2b   : > { %3162 = dma.done.wait (%p3350_p9), [#allocation4], 30720  }
  0x2c   : > { %3164 = vsyncadd (%p3350_p9), [#allocation4], 4294936576  ;;  %p242_p3 = scmp.lt.s32.totalorder %s3167_s12, 1  ;;  %vm339_vm0 = vcmask 1046528   ;;  %vm302_vm1 = vsmask.f32 7424 }
  0x2d   : > { %vm300_vm2 = vcmask 261120   ;;  %vm358_vm3 = vsmask.f32 6400  ;;  %v2749_v12 = vld [vmem:[#allocation3 + $0x4] ss:$24 sps:$4 sm:$0xff]   ;;  %s3180_s18 = smov 64  }
  0x2e   : > { %s3356_s12 = smov (!%p242_p3, %s3167_s12), 1  ;;  %v2751_v17 = vld [vmem:[#allocation3] ss:$24 sps:$4 sm:$0xff]   ;;  %1833 = vmatprep.subr.bf16.mxu1 %v2749_v12  ;;  %v2752_v22 = vld [vmem:[#allocation3 + $0x34] ss:$24 sps:$4 sm:$0xff]   ;;  %s3181_s20 = smov 32  }
  0x2f   : > { %s2673_s7 = sshll.u32 %s3356_s12, 5  ;;  %1834 = vmatpush1.bf16.msra.mxu1 %v2751_v17  ;;  %v2754_v27 = vld [vmem:[#allocation3 + $0x30] ss:$24 sps:$4 sm:$0xff]   ;;  %v2755_v32 = vld [vmem:[#allocation3 + $0x304] ss:$24 sps:$4 sm:$0xff]   ;;  %s3182_s21 = smov 96  }
  0x30   : > { %s250_s10 = scalar_lea.vmem %s3339_s0, %s2673_s7  ;;  %s2675_s11 = sadd.s32 16, %s2673_s7  ;;  %1835 = vmatprep.subr.bf16.mxu1 %v2752_v22  ;;  %v2757_v37 = vld [vmem:[#allocation3 + $0x300] ss:$24 sps:$4 sm:$0xff]   ;;  %v2758_v39 = vld [vmem:[#allocation3 + $0x64] ss:$24 sps:$4 sm:$0xff]   ;;  %1876 = vmatprep.subr.bf16.mxu0 %v2755_v32  ;;  %vm337_vm4 = vcmask 523264  }
  0x31   : > { %s262_s19 = scalar_lea.vmem %s3340_s1, %s2675_s11  ;;  %v3274_v0 = vld [vmem:[%s250_s10] ss:$8 sps:$4 sm:$0xff]   ;;  %v2747_v2 = vld [vmem:[%s250_s10 + $0x4] ss:$8 sps:$4 sm:$0xff]   ;;  %v2761_v45 = vld [vmem:[#allocation3 + $0x334] ss:$24 sps:$4 sm:$0xff]   ;;  %1877 = vmatpush1.bf16.msra.mxu0 %v2757_v37 }
  0x32   : > { %v2745_v1 = vld [vmem:[%s262_s19] ss:$8 sps:$4 sm:$0xff]   ;;  %v2748_v3 = vld [vmem:[%s262_s19 + $0x4] ss:$8 sps:$4 sm:$0xff]   ;;  %v340_v4 = vrot.slane %v3274_v0, 1  ;;  %299 = vst [vmem:[#allocation2] sm:$0xff] %v3274_v0  ;;  %1878 = vmatprep.subr.bf16.mxu0 %v2761_v45 }
  0x33   : > { %v341_v5 = vrot.slane %v2745_v1, 1  ;;  %v304_v6 = vshrl.u32 %v3274_v0, 16  ;;  %v306_v7 = vshll.u32 %v3274_v0, 16  ;;  %v343_v8 = vrot.slane %v2747_v2, 1  ;;  %301 = vst.msk [vmem:[#allocation2 + $0x8] sm:$0xff] %vm300_vm2, %v2747_v2  ;;  %1836 = vmatpush1.bf16.msra.mxu1 %v2754_v27  ;;  %s2701_s22 = smul.u32 48, %s3356_s12 }
  0x34   : > { %v344_v9 = vrot.slane %v2748_v3, 1  ;;  %v311_v10 = vshll.u32 %v2745_v1, 16  ;;  %v316_v11 = vshrl.u32 %v2747_v2, 16  ;;  %v318_v15 = vshll.u32 %v2747_v2, 16  ;;  %v2760_v44 = vld [vmem:[#allocation3 + $0x60] ss:$24 sps:$4 sm:$0xff]   ;;  %1837 = vmatprep.subr.bf16.mxu1 %v2758_v39 }
  0x35   : > { %v342_v13 = vsel %vm339_vm0, %v340_v4, %v341_v5  ;;  %v308_v14 = vrot.slane %v306_v7, 1  ;;  %v323_v16 = vshll.u32 %v2748_v3, 16  ;;  %v359_v20 = vrot.slane %v304_v6, 1  ;;  %v2763_v46 = vld [vmem:[#allocation3 + $0x330] ss:$24 sps:$4 sm:$0xff]   ;;  %s3322_s25 = scalar_lea.vmem %s3342_s3, %s2701_s22 }
  0x36   : > { %346 = vrot.lane.b32.xlu0 %v342_v13, %s3180_s18  ;;  %v345_v18 = vsel %vm339_vm0, %v343_v8, %v344_v9  ;;  %v313_v19 = vrot.slane %v311_v10, 1  ;;  %v360_v21 = vrot.slane %v306_v7, 2  ;;  %v320_v24 = vrot.slane %v318_v15, 1  ;;  %v2764_v47 = vld [vmem:[#allocation3 + $0x94] ss:$24 sps:$4 sm:$0xff]   ;;  %1879 = vmatpush1.bf16.msra.mxu0 %v2763_v46 }
  0x37   : > { %v309_v23 = vor.u32 %v308_v14, %v304_v6  ;;  %v325_v25 = vrot.slane %v323_v16, 1  ;;  %v362_v26 = vshrl.u32 %v2745_v1, 16  ;;  %v365_v29 = vrot.slane %v311_v10, 2  ;;  %v2767_v50 = vld [vmem:[#allocation3 + $0x364] ss:$24 sps:$4 sm:$0xff]   ;;  %1838 = vmatpush1.bf16.msra.mxu1 %v2760_v44 }
  0x38   : > { %v361_v28 = vor.u32 %v360_v21, %v359_v20  ;;  %v368_v30 = vrot.slane %v316_v11, 1  ;;  %v369_v31 = vrot.slane %v318_v15, 2  ;;  %v321_v34 = vor.u32 %v320_v24, %v316_v11  ;;  %v2766_v52 = vld [vmem:[#allocation3 + $0x90] ss:$24 sps:$4 sm:$0xff]   ;;  %1839 = vmatprep.subr.bf16.mxu1 %v2764_v47  ;;  %v2769_v53 = vld [vmem:[#allocation3 + $0x360] ss:$24 sps:$4 sm:$0xff]   ;;  %1880 = vmatprep.subr.bf16.mxu0 %v2767_v50 }
  0x39   : > { %v314_v33 = vsel %vm302_vm1, %v309_v23, %v313_v19  ;;  %v364_v35 = vrot.slane %v362_v26, 1  ;;  %v371_v36 = vshrl.u32 %v2748_v3, 16  ;;  %v374_v38 = vrot.slane %v323_v16, 2  ;;  %v2770_v54 = vld [vmem:[#allocation3 + $0xc4] ss:$24 sps:$4 sm:$0xff]  }
  0x3a   : > { %348 = vrot.lane.b32.xlu0 %v345_v18, %s3180_s18  ;;  %327 = vrot.lane.b32.xlu1 %v314_v33, %s3181_s20  ;;  %v326_v40 = vsel %vm302_vm1, %v321_v34, %v325_v25  ;;  %v370_v42 = vor.u32 %v369_v31, %v368_v30  ;;  %v2773_v55 = vld [vmem:[#allocation3 + $0x394] ss:$24 sps:$4 sm:$0xff]   ;;  %v2772_v56 = vld [vmem:[#allocation3 + $0xc0] ss:$24 sps:$4 sm:$0xff]   ;;  %v2775_v57 = vld [vmem:[#allocation3 + $0x390] ss:$24 sps:$4 sm:$0xff]  }
  0x3b   : > { %v366_v41 = vor.u32 %v365_v29, %v364_v35  ;;  %v373_v43 = vrot.slane %v371_v36, 1  ;;  %1840 = vmatpush1.bf16.msra.mxu1 %v2766_v52  ;;  %1881 = vmatpush1.bf16.msra.mxu0 %v2769_v53  ;;  %v2776_v58 = vld [vmem:[#allocation3 + $0xf4] ss:$24 sps:$4 sm:$0xff]   ;;  %v2779_v59 = vld [vmem:[#allocation3 + $0x3c4] ss:$24 sps:$4 sm:$0xff]   ;;  %vm335_vm5 = vcmask 1047808  }
  0x3c   : > { %1841 = vmatprep.subr.bf16.mxu1 %v2770_v54  ;;  %1882 = vmatprep.subr.bf16.mxu0 %v2773_v55  ;;  %v2778_v60 = vld [vmem:[#allocation3 + $0xf0] ss:$24 sps:$4 sm:$0xff]   ;;  %v2781_v61 = vld [vmem:[#allocation3 + $0x3c0] ss:$24 sps:$4 sm:$0xff]   ;;  %v2782_v62 = vld [vmem:[#allocation3 + $0x124] ss:$24 sps:$4 sm:$0xff]  }
  0x3d   : > { %v367_v48 = vsel %vm358_vm3, %v361_v28, %v366_v41  ;;  %v375_v49 = vor.u32 %v374_v38, %v373_v43  ;;  %v2785_v63 = vld [vmem:[#allocation3 + $0x3f4] ss:$24 sps:$4 sm:$0xff]   ;;  %v2784_v1 = vld [vmem:[#allocation3 + $0x120] ss:$24 sps:$4 sm:$0xff]   ;;  %v2787_v2 = vld [vmem:[#allocation3 + $0x3f0] ss:$24 sps:$4 sm:$0xff]  }
  0x3e   : > { %329 = vrot.lane.b32.xlu1 %v326_v40, %s3181_s20  ;;  %377 = vrot.lane.b32.xlu0 %v367_v48, %s3182_s21  ;;  %v2788_v3 = vld [vmem:[#allocation3 + $0x154] ss:$24 sps:$4 sm:$0xff]   ;;  %v2791_v4 = vld [vmem:[#allocation3 + $0x424] ss:$24 sps:$4 sm:$0xff]   ;;  %v2790_v5 = vld [vmem:[#allocation3 + $0x150] ss:$24 sps:$4 sm:$0xff]  }
  0x3f   : > { %v376_v51 = vsel %vm358_vm3, %v370_v42, %v375_v49  ;;  %1842 = vmatpush1.bf16.msra.mxu1 %v2772_v56  ;;  %1883 = vmatpush1.bf16.msra.mxu0 %v2775_v57  ;;  %v2793_v6 = vld [vmem:[#allocation3 + $0x420] ss:$24 sps:$4 sm:$0xff]   ;;  %v2794_v7 = vld [vmem:[#allocation3 + $0x184] ss:$24 sps:$4 sm:$0xff]   ;;  %v2797_v8 = vld [vmem:[#allocation3 + $0x454] ss:$24 sps:$4 sm:$0xff]  }
  0x40   : > { %1843 = vmatprep.subr.bf16.mxu1 %v2776_v58  ;;  %1884 = vmatprep.subr.bf16.mxu0 %v2779_v59  ;;  %v2796_v9 = vld [vmem:[#allocation3 + $0x180] ss:$24 sps:$4 sm:$0xff]   ;;  %v2799_v10 = vld [vmem:[#allocation3 + $0x450] ss:$24 sps:$4 sm:$0xff]   ;;  %v2800_v11 = vld [vmem:[#allocation3 + $0x1b4] ss:$24 sps:$4 sm:$0xff]  }
  0x41   : > { %v2803_v12 = vld [vmem:[#allocation3 + $0x484] ss:$24 sps:$4 sm:$0xff]   ;;  %v2802_v13 = vld [vmem:[#allocation3 + $0x1b0] ss:$24 sps:$4 sm:$0xff]   ;;  %v2805_v14 = vld [vmem:[#allocation3 + $0x480] ss:$24 sps:$4 sm:$0xff]  }
  0x42   : > { %379 = vrot.lane.b32.xlu1 %v376_v51, %s3182_s21  ;;  %v2806_v15 = vld [vmem:[#allocation3 + $0x1e4] ss:$24 sps:$4 sm:$0xff]   ;;  %v2809_v16 = vld [vmem:[#allocation3 + $0x4b4] ss:$24 sps:$4 sm:$0xff]   ;;  %v2808_v17 = vld [vmem:[#allocation3 + $0x1e0] ss:$24 sps:$4 sm:$0xff]  }
  0x43   : > { %1844 = vmatpush1.bf16.msra.mxu1 %v2778_v60  ;;  %1885 = vmatpush1.bf16.msra.mxu0 %v2781_v61  ;;  %v2811_v18 = vld [vmem:[#allocation3 + $0x4b0] ss:$24 sps:$4 sm:$0xff]   ;;  %v2812_v19 = vld [vmem:[#allocation3 + $0x214] ss:$24 sps:$4 sm:$0xff]   ;;  %v2815_v20 = vld [vmem:[#allocation3 + $0x4e4] ss:$24 sps:$4 sm:$0xff]  }
  0x44   : > { %1845 = vmatprep.subr.bf16.mxu1 %v2782_v62  ;;  %1886 = vmatprep.subr.bf16.mxu0 %v2785_v63  ;;  %v2814_v21 = vld [vmem:[#allocation3 + $0x210] ss:$24 sps:$4 sm:$0xff]   ;;  %v2817_v22 = vld [vmem:[#allocation3 + $0x4e0] ss:$24 sps:$4 sm:$0xff]   ;;  %v2818_v23 = vld [vmem:[#allocation3 + $0x244] ss:$24 sps:$4 sm:$0xff]  }
  0x45   : > { %v2821_v24 = vld [vmem:[#allocation3 + $0x514] ss:$24 sps:$4 sm:$0xff]   ;;  %v2820_v25 = vld [vmem:[#allocation3 + $0x240] ss:$24 sps:$4 sm:$0xff]   ;;  %v2823_v26 = vld [vmem:[#allocation3 + $0x510] ss:$24 sps:$4 sm:$0xff]  }
  0x46   : > { %v2824_v27 = vld [vmem:[#allocation3 + $0x274] ss:$24 sps:$4 sm:$0xff]   ;;  %v2827_v28 = vld [vmem:[#allocation3 + $0x544] ss:$24 sps:$4 sm:$0xff]   ;;  %v2826_v29 = vld [vmem:[#allocation3 + $0x270] ss:$24 sps:$4 sm:$0xff]  }
  0x47   : > { %1846 = vmatpush1.bf16.msra.mxu1 %v2784_v1  ;;  %1887 = vmatpush1.bf16.msra.mxu0 %v2787_v2  ;;  %v2829_v30 = vld [vmem:[#allocation3 + $0x540] ss:$24 sps:$4 sm:$0xff]   ;;  %v2830_v31 = vld [vmem:[#allocation3 + $0x2a4] ss:$24 sps:$4 sm:$0xff]   ;;  %v2833_v33 = vld [vmem:[#allocation3 + $0x574] ss:$24 sps:$4 sm:$0xff]  }
  0x48   : > { %1847 = vmatprep.subr.bf16.mxu1 %v2788_v3  ;;  %1888 = vmatprep.subr.bf16.mxu0 %v2791_v4  ;;  %v2832_v32 = vld [vmem:[#allocation3 + $0x2a0] ss:$24 sps:$4 sm:$0xff]   ;;  %v2835_v34 = vld [vmem:[#allocation3 + $0x570] ss:$24 sps:$4 sm:$0xff]   ;;  %v2836_v37 = vld [vmem:[#allocation3 + $0x2d4] ss:$24 sps:$4 sm:$0xff]  }
  0x49   : > { %v483_v35 = vld [vmem:[#allocation3 + $0x2d0] sm:$0xff]  ;;  %v486_v36 = vld [vmem:[#allocation3 + $0x2e8] sm:$0xff]  ;;  %v2838_v38 = vld [vmem:[#allocation3 + $0x5a4] ss:$24 sps:$4 sm:$0xff]   ;;  %vm356_vm6 = vcmask 785408   ;;  %vm385_vm7 = vcmask 1048320  }
  0x4a   : > { %v2521_v39 = vcombine.low %v483_v35, %v486_v36  ;;  %v2840_v40 = vld [vmem:[#allocation3 + $0x5a0] ss:$24 sps:$4 sm:$0xff]   ;;  %v2843_v41 = vld [vmem:[#allocation3 + $0xc] ss:$24 sps:$4 sm:$0xff]   ;;  %v2846_v43 = vld [vmem:[#allocation3 + $0x5d0] ss:$24 sps:$4 sm:$0xff]  }
  0x4b   : > { %1848 = vmatpush1.bf16.msra.mxu1 %v2790_v5  ;;  %1889 = vmatpush1.bf16.msra.mxu0 %v2793_v6  ;;  %v2844_v42 = vld [vmem:[#allocation3 + $0x5d4] ss:$24 sps:$4 sm:$0xff]   ;;  %v2852_v44 = vld [vmem:[#allocation3 + $0x604] ss:$24 sps:$4 sm:$0xff]   ;;  %vm354_vm8 = vcmask 1048064   ;;  %v3183_v3 = vmov 0  }
  0x4c   : > { %1849 = vmatprep.subr.bf16.mxu1 %v2794_v7  ;;  %1890 = vmatprep.subr.bf16.mxu0 %v2797_v8  ;;  %v2841_v52 = vld [vmem:[#allocation3 + $0x8] ss:$24 sps:$4 sm:$0xff]   ;;  %v2849_v55 = vld [vmem:[#allocation3 + $0x3c] ss:$24 sps:$4 sm:$0xff]   ;;  %v2847_v57 = vld [vmem:[#allocation3 + $0x38] ss:$24 sps:$4 sm:$0xff]  }
  0x4d   : > { %v2850_v59 = vld [vmem:[#allocation3 + $0x600] ss:$24 sps:$4 sm:$0xff]   ;;  %v2855_v60 = vld [vmem:[#allocation3 + $0x6c] ss:$24 sps:$4 sm:$0xff]   ;;  %v2861_v1 = vld [vmem:[#allocation3 + $0x9c] ss:$24 sps:$4 sm:$0xff]  }
  0x4e   : > { %v2858_v61 = vld [vmem:[#allocation3 + $0x634] ss:$24 sps:$4 sm:$0xff]   ;;  %v2853_v63 = vld [vmem:[#allocation3 + $0x68] ss:$24 sps:$4 sm:$0xff]   ;;  %v2864_v2 = vld [vmem:[#allocation3 + $0x664] ss:$24 sps:$4 sm:$0xff]  }
  0x4f   : > { %1850 = vmatpush1.bf16.msra.mxu1 %v2796_v9  ;;  %1891 = vmatpush1.bf16.msra.mxu0 %v2799_v10  ;;  %v2859_v4 = vld [vmem:[#allocation3 + $0x98] ss:$24 sps:$4 sm:$0xff]   ;;  %v2867_v6 = vld [vmem:[#allocation3 + $0xcc] ss:$24 sps:$4 sm:$0xff]   ;;  %v2865_v8 = vld [vmem:[#allocation3 + $0xc8] ss:$24 sps:$4 sm:$0xff]  }
  0x50   : > { %1851 = vmatprep.subr.bf16.mxu1 %v2800_v11  ;;  %1892 = vmatprep.subr.bf16.mxu0 %v2803_v12  ;;  %v2862_v5 = vld [vmem:[#allocation3 + $0x660] ss:$24 sps:$4 sm:$0xff]   ;;  %v2870_v7 = vld [vmem:[#allocation3 + $0x694] ss:$24 sps:$4 sm:$0xff]   ;;  %v2868_v9 = vld [vmem:[#allocation3 + $0x690] ss:$24 sps:$4 sm:$0xff]  }
  0x51   : > { %v2873_v10 = vld [vmem:[#allocation3 + $0xfc] ss:$24 sps:$4 sm:$0xff]   ;;  %v2871_v12 = vld [vmem:[#allocation3 + $0xf8] ss:$24 sps:$4 sm:$0xff]  }
  0x52   : > { %v2876_v11 = vld [vmem:[#allocation3 + $0x6c4] ss:$24 sps:$4 sm:$0xff]   ;;  %v2912_v35 = vld [vmem:[#allocation3 + $0x74] ss:$24 sps:$4 sm:$0xff]   ;;  %v2907_v36 = vld [vmem:[#allocation3 + $0x218] ss:$24 sps:$4 sm:$0xff]  }
  0x53   : > { %1852 = vmatpush1.bf16.msra.mxu1 %v2802_v13  ;;  %1893 = vmatpush1.bf16.msra.mxu0 %v2805_v14  ;;  %v2874_v13 = vld [vmem:[#allocation3 + $0x6c0] ss:$24 sps:$4 sm:$0xff]   ;;  %v2879_v14 = vld [vmem:[#allocation3 + $0x12c] ss:$24 sps:$4 sm:$0xff]  }
  0x54   : > { %1853 = vmatprep.subr.bf16.mxu1 %v2806_v15  ;;  %1894 = vmatprep.subr.bf16.mxu0 %v2809_v16  ;;  %v2882_v15 = vld [vmem:[#allocation3 + $0x6f4] ss:$24 sps:$4 sm:$0xff]   ;;  %v2877_v16 = vld [vmem:[#allocation3 + $0x128] ss:$24 sps:$4 sm:$0xff]  }
  0x57   : > { %1854 = vmatpush1.bf16.msra.mxu1 %v2808_v17  ;;  %1895 = vmatpush1.bf16.msra.mxu0 %v2811_v18  ;;  %v2880_v17 = vld [vmem:[#allocation3 + $0x6f0] ss:$24 sps:$4 sm:$0xff]   ;;  %v2885_v18 = vld [vmem:[#allocation3 + $0x15c] ss:$24 sps:$4 sm:$0xff]  }
  0x58   : > { %1855 = vmatprep.subr.bf16.mxu1 %v2812_v19  ;;  %1896 = vmatprep.subr.bf16.mxu0 %v2815_v20  ;;  %v2888_v19 = vld [vmem:[#allocation3 + $0x724] ss:$24 sps:$4 sm:$0xff]   ;;  %v2883_v20 = vld [vmem:[#allocation3 + $0x158] ss:$24 sps:$4 sm:$0xff]  }
  0x5b   : > { %1856 = vmatpush1.bf16.msra.mxu1 %v2814_v21  ;;  %1897 = vmatpush1.bf16.msra.mxu0 %v2817_v22  ;;  %v2886_v21 = vld [vmem:[#allocation3 + $0x720] ss:$24 sps:$4 sm:$0xff]   ;;  %v2891_v22 = vld [vmem:[#allocation3 + $0x18c] ss:$24 sps:$4 sm:$0xff]  }
  0x5c   : > { %1857 = vmatprep.subr.bf16.mxu1 %v2818_v23  ;;  %1898 = vmatprep.subr.bf16.mxu0 %v2821_v24  ;;  %v2894_v23 = vld [vmem:[#allocation3 + $0x754] ss:$24 sps:$4 sm:$0xff]   ;;  %v2889_v24 = vld [vmem:[#allocation3 + $0x188] ss:$24 sps:$4 sm:$0xff]  }
  0x5f   : > { %1858 = vmatpush1.bf16.msra.mxu1 %v2820_v25  ;;  %1899 = vmatpush1.bf16.msra.mxu0 %v2823_v26  ;;  %v2892_v25 = vld [vmem:[#allocation3 + $0x750] ss:$24 sps:$4 sm:$0xff]   ;;  %v2897_v26 = vld [vmem:[#allocation3 + $0x1bc] ss:$24 sps:$4 sm:$0xff]  }
  0x60   : > { %1859 = vmatprep.subr.bf16.mxu1 %v2824_v27  ;;  %1900 = vmatprep.subr.bf16.mxu0 %v2827_v28  ;;  %v2900_v27 = vld [vmem:[#allocation3 + $0x14] ss:$24 sps:$4 sm:$0xff]   ;;  %v2895_v28 = vld [vmem:[#allocation3 + $0x1b8] ss:$24 sps:$4 sm:$0xff]  }
  0x63   : > { %1860 = vmatpush1.bf16.msra.mxu1 %v2826_v29  ;;  %1901 = vmatpush1.bf16.msra.mxu0 %v2829_v30  ;;  %v2898_v29 = vld [vmem:[#allocation3 + $0x10] ss:$24 sps:$4 sm:$0xff]   ;;  %v2903_v30 = vld [vmem:[#allocation3 + $0x1ec] ss:$24 sps:$4 sm:$0xff]  }
  0x64   : > { %1861 = vmatprep.subr.bf16.mxu1 %v2830_v31  ;;  %1902 = vmatprep.subr.bf16.mxu0 %v2833_v33  ;;  %v2906_v31 = vld [vmem:[#allocation3 + $0x44] ss:$24 sps:$4 sm:$0xff]   ;;  %v2904_v33 = vld [vmem:[#allocation3 + $0x40] ss:$24 sps:$4 sm:$0xff]  }
  0x67   : > { %1862 = vmatpush1.bf16.msra.mxu1 %v2832_v32  ;;  %1903 = vmatpush1.bf16.msra.mxu0 %v2835_v34  ;;  %v2901_v32 = vld [vmem:[#allocation3 + $0x1e8] ss:$24 sps:$4 sm:$0xff]   ;;  %v2909_v34 = vld [vmem:[#allocation3 + $0x21c] ss:$24 sps:$4 sm:$0xff]  }
  0x68   : > { %1863 = vmatprep.subr.bf16.mxu1 %v2836_v37  ;;  %1904 = vmatprep.subr.bf16.mxu0 %v2838_v38  ;;  %v2910_v37 = vld [vmem:[#allocation3 + $0x70] ss:$24 sps:$4 sm:$0xff]   ;;  %v2915_v38 = vld [vmem:[#allocation3 + $0x24c] ss:$24 sps:$4 sm:$0xff]  }
  0x6b   : > { %1864 = vmatpush1.bf16.msra.mxu1 %v2521_v39  ;;  %1905 = vmatpush1.bf16.msra.mxu0 %v2840_v40  ;;  %v2918_v39 = vld [vmem:[#allocation3 + $0xa4] ss:$24 sps:$4 sm:$0xff]   ;;  %v2913_v40 = vld [vmem:[#allocation3 + $0x248] ss:$24 sps:$4 sm:$0xff]  }
  0x6c   : > { %1962 = vmatprep.subr.bf16.mxu1 %v2843_v41  ;;  %1906 = vmatprep.subr.bf16.mxu0 %v2844_v42  ;;  %v2916_v41 = vld [vmem:[#allocation3 + $0xa0] ss:$24 sps:$4 sm:$0xff]   ;;  %v2921_v42 = vld [vmem:[#allocation3 + $0x27c] ss:$24 sps:$4 sm:$0xff]  }
  0x6f   : > { %1907 = vmatpush1.bf16.msra.mxu0 %v2846_v43  ;;  %v2924_v43 = vld [vmem:[#allocation3 + $0xd4] ss:$24 sps:$4 sm:$0xff]  }
  0x70   : > { %1919 = vmatprep.subr.bf16.mxu0 %v2852_v44  ;;  %v2919_v44 = vld [vmem:[#allocation3 + $0x278] ss:$24 sps:$4 sm:$0xff]  }
  0xa8   : > { %v347_v45 = vpop.permute.xlu0 %346 }
  0xac   : > { %v349_v46 = vpop.permute.xlu0 %348  ;;  %v328_v47 = vpop.permute.xlu1 %327 }
  0xad   : > { %v351_v48 = vsel %vm337_vm4, %v347_v45, %v349_v46  ;;  %336 = vst.msk [vmem:[#allocation2 + $0x8] sm:$0xff] %vm335_vm5, %v328_v47  ;;  %v2927_v46 = vld [vmem:[#allocation3 + $0x2ac] ss:$24 sps:$4 sm:$0xff]  }
  0xae   : > { %357 = vst.msk [vmem:[#allocation2 + $0x18] sm:$0xff] %vm356_vm6, %v351_v48  ;;  %v2925_v48 = vld [vmem:[#allocation3 + $0x2a8] ss:$24 sps:$4 sm:$0xff]  }
  0xb0   : > { %v330_v49 = vpop.permute.xlu1 %329  ;;  %v378_v50 = vpop.permute.xlu0 %377 }
  0xb1   : > { %v332_v51 = vsel %vm300_vm2, %v328_v47, %v330_v49  ;;  %386 = vst.msk [vmem:[#allocation2 + $0x18] sm:$0xff] %vm385_vm7, %v378_v50  ;;  %v2930_v47 = vld [vmem:[#allocation3 + $0x104] ss:$24 sps:$4 sm:$0xff]   ;;  %v2928_v49 = vld [vmem:[#allocation3 + $0x100] ss:$24 sps:$4 sm:$0xff]  }
  0xb2   : > { %338 = vst.msk [vmem:[#allocation2 + $0x10] sm:$0xff] %vm337_vm4, %v332_v51  ;;  %v2936_v51 = vld [vmem:[#allocation3 + $0x134] ss:$24 sps:$4 sm:$0xff]  }
  0xb3   : > { %355 = vst.msk [vmem:[#allocation2 + $0x10] sm:$0xff] %vm354_vm8, %v347_v45  ;;  %v2922_v45 = vld [vmem:[#allocation3 + $0xd0] ss:$24 sps:$4 sm:$0xff]  }
  0xb4   : > { %v380_v53 = vpop.permute.xlu1 %379  ;;  %v3289_v54 = vld [vmem:[#allocation2 + $0x8] sm:$0xff] }
  0xb5   : > { %v3292_v56 = vsel %vm356_vm6, %v378_v50, %v380_v53  ;;  %1865 = vmatprep.mubr.bf16.mxu1 %v3289_v54  ;;  %v2933_v50 = vld [vmem:[#allocation3 + $0x2dc] ss:$24 sps:$4 sm:$0xff]   ;;  %v2934_v53 = vld [vmem:[#allocation3 + $0x130] ss:$24 sps:$4 sm:$0xff]  }
  0xb6   : > { %1866 = vmatmul.mubr.bf16.vlgmr.msra.gmra.mrb[0].mxu1 %v3274_v0  ;;  %v2856_v0 = vld [vmem:[#allocation3 + $0x630] ss:$24 sps:$4 sm:$0xff]  }
  0xb7   : > { %1963 = vmatpush1.bf16.msra.mxu1 %v2841_v52  ;;  %1994 = vmatprep.mubr.bf16.mxu1 %v3289_v54  ;;  %v2931_v52 = vld [vmem:[#allocation3 + $0x2d8] ss:$24 sps:$4 sm:$0xff]  }
  0xb8   : > { %1964 = vmatprep.subr.bf16.mxu1 %v2849_v55  ;;  %v3297_v58 = vld [vmem:[#allocation2 + $0x18] sm:$0xff]  ;;  %v2942_v55 = vld [vmem:[#allocation3 + $0x164] ss:$24 sps:$4 sm:$0xff]  }
  0xb9   : > { %1908 = vmatprep.mubr.bf16.mxu0 %v3297_v58 }
  0xba   : > { %v3300_v62 = vld [vmem:[#allocation2 + $0x10] sm:$0xff] }
  0xbb   : > { %1965 = vmatpush1.bf16.msra.mxu1 %v2847_v57  ;;  %1909 = vmatmul.mubr.bf16.vlgmr.msra.gmra.mrb[0].mxu0 %v3300_v62  ;;  %v2937_v57 = vld [vmem:[#allocation3 + $0x308] ss:$24 sps:$4 sm:$0xff]  }
  0xbc   : > { %1920 = vmatpush1.bf16.msra.mxu0 %v2850_v59  ;;  %1966 = vmatprep.subr.bf16.mxu1 %v2855_v60  ;;  %v2940_v59 = vld [vmem:[#allocation3 + $0x160] ss:$24 sps:$4 sm:$0xff]   ;;  %v2945_v60 = vld [vmem:[#allocation3 + $0x33c] ss:$24 sps:$4 sm:$0xff]  }
  0xbd   : > { %1921 = vmatprep.subr.bf16.mxu0 %v2858_v61  ;;  %1951 = vmatprep.mubr.bf16.mxu0 %v3183_v3  ;;  %v2948_v61 = vld [vmem:[#allocation3 + $0x194] ss:$24 sps:$4 sm:$0xff]  }
  0xbf   : > { %1967 = vmatpush1.bf16.msra.mxu1 %v2853_v63  ;;  %v3306_v63 = vld [vmem:[#allocation2] sm:$0xff] }
  0xc0   : > { %1922 = vmatpush1.bf16.msra.mxu0 %v2856_v0  ;;  %1968 = vmatprep.subr.bf16.mxu1 %v2861_v1  ;;  %v2943_v0 = vld [vmem:[#allocation3 + $0x338] ss:$24 sps:$4 sm:$0xff]  }
  0xc1   : > { %1923 = vmatprep.subr.bf16.mxu0 %v2864_v2  ;;  %v2946_v1 = vld [vmem:[#allocation3 + $0x190] ss:$24 sps:$4 sm:$0xff]   ;;  %v2951_v2 = vld [vmem:[#allocation3 + $0x36c] ss:$24 sps:$4 sm:$0xff]  }
  0xc3   : > { %1969 = vmatpush1.bf16.msra.mxu1 %v2859_v4  ;;  %v2954_v4 = vld [vmem:[#allocation3 + $0x1c4] ss:$24 sps:$4 sm:$0xff]  }
  0xc4   : > { %1924 = vmatpush1.bf16.msra.mxu0 %v2862_v5  ;;  %1970 = vmatprep.subr.bf16.mxu1 %v2867_v6  ;;  %v2949_v5 = vld [vmem:[#allocation3 + $0x368] ss:$24 sps:$4 sm:$0xff]  }
  0xc5   : > { %1925 = vmatprep.subr.bf16.mxu0 %v2870_v7  ;;  %v2952_v6 = vld [vmem:[#allocation3 + $0x1c0] ss:$24 sps:$4 sm:$0xff]   ;;  %v2957_v7 = vld [vmem:[#allocation3 + $0x39c] ss:$24 sps:$4 sm:$0xff]  }
  0xc7   : > { %1971 = vmatpush1.bf16.msra.mxu1 %v2865_v8  ;;  %v2960_v8 = vld [vmem:[#allocation3 + $0x1f4] ss:$24 sps:$4 sm:$0xff]  }
  0xc8   : > { %1926 = vmatpush1.bf16.msra.mxu0 %v2868_v9  ;;  %1972 = vmatprep.subr.bf16.mxu1 %v2873_v10  ;;  %v2955_v9 = vld [vmem:[#allocation3 + $0x398] ss:$24 sps:$4 sm:$0xff]  }
  0xc9   : > { %1927 = vmatprep.subr.bf16.mxu0 %v2876_v11  ;;  %v2958_v10 = vld [vmem:[#allocation3 + $0x1f0] ss:$24 sps:$4 sm:$0xff]   ;;  %v2963_v11 = vld [vmem:[#allocation3 + $0x3cc] ss:$24 sps:$4 sm:$0xff]  }
  0xcb   : > { %1973 = vmatpush1.bf16.msra.mxu1 %v2871_v12  ;;  %v2966_v12 = vld [vmem:[#allocation3 + $0x224] ss:$24 sps:$4 sm:$0xff]  }
  0xcc   : > { %1928 = vmatpush1.bf16.msra.mxu0 %v2874_v13  ;;  %1974 = vmatprep.subr.bf16.mxu1 %v2879_v14  ;;  %v2961_v13 = vld [vmem:[#allocation3 + $0x3c8] ss:$24 sps:$4 sm:$0xff]  }
  0xcd   : > { %1929 = vmatprep.subr.bf16.mxu0 %v2882_v15  ;;  %v2964_v14 = vld [vmem:[#allocation3 + $0x220] ss:$24 sps:$4 sm:$0xff]   ;;  %v2969_v15 = vld [vmem:[#allocation3 + $0x3fc] ss:$24 sps:$4 sm:$0xff]  }
  0xcf   : > { %1975 = vmatpush1.bf16.msra.mxu1 %v2877_v16  ;;  %v2972_v16 = vld [vmem:[#allocation3 + $0x254] ss:$24 sps:$4 sm:$0xff]  }
  0xd0   : > { %1930 = vmatpush1.bf16.msra.mxu0 %v2880_v17  ;;  %1976 = vmatprep.subr.bf16.mxu1 %v2885_v18  ;;  %v2967_v17 = vld [vmem:[#allocation3 + $0x3f8] ss:$24 sps:$4 sm:$0xff]  }
  0xd1   : > { %1931 = vmatprep.subr.bf16.mxu0 %v2888_v19  ;;  %v2970_v18 = vld [vmem:[#allocation3 + $0x250] ss:$24 sps:$4 sm:$0xff]   ;;  %v2975_v19 = vld [vmem:[#allocation3 + $0x42c] ss:$24 sps:$4 sm:$0xff]  }
  0xd3   : > { %1977 = vmatpush1.bf16.msra.mxu1 %v2883_v20  ;;  %v2978_v20 = vld [vmem:[#allocation3 + $0x284] ss:$24 sps:$4 sm:$0xff]  }
  0xd4   : > { %1932 = vmatpush1.bf16.msra.mxu0 %v2886_v21  ;;  %1978 = vmatprep.subr.bf16.mxu1 %v2891_v22  ;;  %v2973_v21 = vld [vmem:[#allocation3 + $0x428] ss:$24 sps:$4 sm:$0xff]  }
  0xd5   : > { %1933 = vmatprep.subr.bf16.mxu0 %v2894_v23  ;;  %v2976_v22 = vld [vmem:[#allocation3 + $0x280] ss:$24 sps:$4 sm:$0xff]   ;;  %v2981_v23 = vld [vmem:[#allocation3 + $0x45c] ss:$24 sps:$4 sm:$0xff]  }
  0xd7   : > { %1979 = vmatpush1.bf16.msra.mxu1 %v2889_v24  ;;  %v2984_v24 = vld [vmem:[#allocation3 + $0x2b4] ss:$24 sps:$4 sm:$0xff]  }
  0xd8   : > { %1934 = vmatpush1.bf16.msra.mxu0 %v2892_v25  ;;  %1980 = vmatprep.subr.bf16.mxu1 %v2897_v26  ;;  %v2979_v25 = vld [vmem:[#allocation3 + $0x458] ss:$24 sps:$4 sm:$0xff]  }
  0xd9   : > { %2091 = vmatprep.subr.bf16.mxu0 %v2900_v27  ;;  %v2982_v26 = vld [vmem:[#allocation3 + $0x2b0] ss:$24 sps:$4 sm:$0xff]   ;;  %v2987_v27 = vld [vmem:[#allocation3 + $0x48c] ss:$24 sps:$4 sm:$0xff]  }
  0xdb   : > { %1952 = vmatmul.mubr.bf16.vlgmr.msra.gmra.mrb[0].mxu0 %v3292_v56  ;;  %1981 = vmatpush1.bf16.msra.mxu1 %v2895_v28  ;;  %v2990_v28 = vld [vmem:[#allocation3 + $0x2e4] ss:$24 sps:$4 sm:$0xff]  }
  0xdc   : > { %2092 = vmatpush1.bf16.msra.mxu0 %v2898_v29  ;;  %2123 = vmatprep.mubr.bf16.mxu0 %v3289_v54  ;;  %v2939_v54 = vld [vmem:[#allocation3 + $0x30c] ss:$24 sps:$4 sm:$0xff]   ;;  %v2985_v29 = vld [vmem:[#allocation3 + $0x488] ss:$24 sps:$4 sm:$0xff]  }
  0xdd   : > { %1982 = vmatprep.subr.bf16.mxu1 %v2903_v30  ;;  %2093 = vmatprep.subr.bf16.mxu0 %v2906_v31  ;;  %v2988_v30 = vld [vmem:[#allocation3 + $0x2e0] ss:$24 sps:$4 sm:$0xff]   ;;  %v2993_v31 = vld [vmem:[#allocation3 + $0x4bc] ss:$24 sps:$4 sm:$0xff]  }
  0xdf   : > { %1983 = vmatpush1.bf16.msra.mxu1 %v2901_v32  ;;  %v2996_v32 = vld [vmem:[#allocation3 + $0x314] ss:$24 sps:$4 sm:$0xff]  }
  0xe0   : > { %2094 = vmatpush1.bf16.msra.mxu0 %v2904_v33  ;;  %1984 = vmatprep.subr.bf16.mxu1 %v2909_v34  ;;  %v2991_v33 = vld [vmem:[#allocation3 + $0x4b8] ss:$24 sps:$4 sm:$0xff]  }
  0xe1   : > { %2095 = vmatprep.subr.bf16.mxu0 %v2912_v35  ;;  %v2994_v34 = vld [vmem:[#allocation3 + $0x310] ss:$24 sps:$4 sm:$0xff]   ;;  %v2999_v35 = vld [vmem:[#allocation3 + $0x4ec] ss:$24 sps:$4 sm:$0xff]  }
  0xe3   : > { %1985 = vmatpush1.bf16.msra.mxu1 %v2907_v36  ;;  %v3002_v36 = vld [vmem:[#allocation3 + $0x344] ss:$24 sps:$4 sm:$0xff]  }
  0xe4   : > { %2096 = vmatpush1.bf16.msra.mxu0 %v2910_v37  ;;  %1986 = vmatprep.subr.bf16.mxu1 %v2915_v38  ;;  %v2997_v37 = vld [vmem:[#allocation3 + $0x4e8] ss:$24 sps:$4 sm:$0xff]  }
  0xe5   : > { %2097 = vmatprep.subr.bf16.mxu0 %v2918_v39  ;;  %v3000_v38 = vld [vmem:[#allocation3 + $0x340] ss:$24 sps:$4 sm:$0xff]   ;;  %v3005_v39 = vld [vmem:[#allocation3 + $0x51c] ss:$24 sps:$4 sm:$0xff]  }
  0xe7   : > { %1987 = vmatpush1.bf16.msra.mxu1 %v2913_v40  ;;  %v3008_v40 = vld [vmem:[#allocation3 + $0x374] ss:$24 sps:$4 sm:$0xff]  }
  0xe8   : > { %2098 = vmatpush1.bf16.msra.mxu0 %v2916_v41  ;;  %1988 = vmatprep.subr.bf16.mxu1 %v2921_v42  ;;  %v3003_v41 = vld [vmem:[#allocation3 + $0x518] ss:$24 sps:$4 sm:$0xff]  }
  0xe9   : > { %2099 = vmatprep.subr.bf16.mxu0 %v2924_v43  ;;  %v3006_v42 = vld [vmem:[#allocation3 + $0x370] ss:$24 sps:$4 sm:$0xff]   ;;  %v3011_v43 = vld [vmem:[#allocation3 + $0x54c] ss:$24 sps:$4 sm:$0xff]  }
  0xeb   : > { %1989 = vmatpush1.bf16.msra.mxu1 %v2919_v44  ;;  %v3014_v44 = vld [vmem:[#allocation3 + $0x3a4] ss:$24 sps:$4 sm:$0xff]  }
  0xec   : > { %2100 = vmatpush1.bf16.msra.mxu0 %v2922_v45  ;;  %1990 = vmatprep.subr.bf16.mxu1 %v2927_v46  ;;  %v3009_v45 = vld [vmem:[#allocation3 + $0x548] ss:$24 sps:$4 sm:$0xff]  }
  0xed   : > { %2101 = vmatprep.subr.bf16.mxu0 %v2930_v47  ;;  %v3012_v46 = vld [vmem:[#allocation3 + $0x3a0] ss:$24 sps:$4 sm:$0xff]   ;;  %v3017_v47 = vld [vmem:[#allocation3 + $0x57c] ss:$24 sps:$4 sm:$0xff]  }
  0xef   : > { %1991 = vmatpush1.bf16.msra.mxu1 %v2925_v48  ;;  %v3015_v48 = vld [vmem:[#allocation3 + $0x578] ss:$24 sps:$4 sm:$0xff]  }
  0xf0   : > { %2102 = vmatpush1.bf16.msra.mxu0 %v2928_v49  ;;  %1992 = vmatprep.subr.bf16.mxu1 %v2933_v50  ;;  %v3018_v49 = vld [vmem:[#allocation3 + $0x3d0] ss:$24 sps:$4 sm:$0xff]   ;;  %v3023_v50 = vld [vmem:[#allocation3 + $0x5ac] ss:$24 sps:$4 sm:$0xff]  }
  0xf1   : > { %2103 = vmatprep.subr.bf16.mxu0 %v2936_v51  ;;  %v3026_v51 = vld [vmem:[#allocation3 + $0x404] ss:$24 sps:$4 sm:$0xff]  }
  0xf3   : > { %1993 = vmatpush1.bf16.msra.mxu1 %v2931_v52  ;;  %v3021_v52 = vld [vmem:[#allocation3 + $0x5a8] ss:$24 sps:$4 sm:$0xff]  }
  0xf4   : > { %2104 = vmatpush1.bf16.msra.mxu0 %v2934_v53  ;;  %2005 = vmatprep.subr.bf16.mxu1 %v2939_v54  ;;  %v3024_v53 = vld [vmem:[#allocation3 + $0x400] ss:$24 sps:$4 sm:$0xff]   ;;  %v3029_v54 = vld [vmem:[#allocation3 + $0x5dc] ss:$24 sps:$4 sm:$0xff]  }
  0xf5   : > { %2105 = vmatprep.subr.bf16.mxu0 %v2942_v55  ;;  %v3032_v55 = vld [vmem:[#allocation3 + $0x434] ss:$24 sps:$4 sm:$0xff]  }
  0xf6   : > { %1995 = vmatmul.mubr.bf16.vlgmr.msra.gmra.mrb[4].mxu1 %v3306_v63 }
  0xf7   : > { %2006 = vmatpush1.bf16.msra.mxu1 %v2937_v57  ;;  %2037 = vmatprep.mubr.bf16.mxu1 %v3297_v58  ;;  %v3027_v57 = vld [vmem:[#allocation3 + $0x5d8] ss:$24 sps:$4 sm:$0xff]  }
  0xf8   : > { %2106 = vmatpush1.bf16.msra.mxu0 %v2940_v59  ;;  %2007 = vmatprep.subr.bf16.mxu1 %v2945_v60  ;;  %v3030_v59 = vld [vmem:[#allocation3 + $0x430] ss:$24 sps:$4 sm:$0xff]   ;;  %v3035_v60 = vld [vmem:[#allocation3 + $0x60c] ss:$24 sps:$4 sm:$0xff]  }
  0xf9   : > { %2107 = vmatprep.subr.bf16.mxu0 %v2948_v61  ;;  %v3038_v61 = vld [vmem:[#allocation3 + $0x464] ss:$24 sps:$4 sm:$0xff]  }
  0xfb   : > { %2008 = vmatpush1.bf16.msra.mxu1 %v2943_v0  ;;  %v3036_v0 = vld [vmem:[#allocation3 + $0x460] ss:$24 sps:$4 sm:$0xff]  }
  0xfc   : > { %2108 = vmatpush1.bf16.msra.mxu0 %v2946_v1  ;;  %2009 = vmatprep.subr.bf16.mxu1 %v2951_v2  ;;  %v3041_v1 = vld [vmem:[#allocation3 + $0x63c] ss:$24 sps:$4 sm:$0xff]  }
  0xfd   : > { %2109 = vmatprep.subr.bf16.mxu0 %v2954_v4  ;;  %v3044_v2 = vld [vmem:[#allocation3 + $0x494] ss:$24 sps:$4 sm:$0xff]   ;;  %v3039_v4 = vld [vmem:[#allocation3 + $0x638] ss:$24 sps:$4 sm:$0xff]  }
  0xff   : > { %2010 = vmatpush1.bf16.msra.mxu1 %v2949_v5  ;;  %v3042_v5 = vld [vmem:[#allocation3 + $0x490] ss:$24 sps:$4 sm:$0xff]  }
 0x100   : > { %2110 = vmatpush1.bf16.msra.mxu0 %v2952_v6  ;;  %2011 = vmatprep.subr.bf16.mxu1 %v2957_v7  ;;  %v3047_v6 = vld [vmem:[#allocation3 + $0x66c] ss:$24 sps:$4 sm:$0xff]  }
 0x101   : > { %2111 = vmatprep.subr.bf16.mxu0 %v2960_v8  ;;  %v3050_v7 = vld [vmem:[#allocation3 + $0x4c4] ss:$24 sps:$4 sm:$0xff]   ;;  %v3045_v8 = vld [vmem:[#allocation3 + $0x668] ss:$24 sps:$4 sm:$0xff]  }
 0x103   : > { %2012 = vmatpush1.bf16.msra.mxu1 %v2955_v9  ;;  %v3048_v9 = vld [vmem:[#allocation3 + $0x4c0] ss:$24 sps:$4 sm:$0xff]  }
 0x104   : > { %2112 = vmatpush1.bf16.msra.mxu0 %v2958_v10  ;;  %2013 = vmatprep.subr.bf16.mxu1 %v2963_v11  ;;  %v3053_v10 = vld [vmem:[#allocation3 + $0x69c] ss:$24 sps:$4 sm:$0xff]  }
 0x105   : > { %2113 = vmatprep.subr.bf16.mxu0 %v2966_v12  ;;  %v3056_v11 = vld [vmem:[#allocation3 + $0x4f4] ss:$24 sps:$4 sm:$0xff]   ;;  %v3051_v12 = vld [vmem:[#allocation3 + $0x698] ss:$24 sps:$4 sm:$0xff]  }
 0x107   : > { %2014 = vmatpush1.bf16.msra.mxu1 %v2961_v13  ;;  %v3054_v13 = vld [vmem:[#allocation3 + $0x4f0] ss:$24 sps:$4 sm:$0xff]  }
 0x108   : > { %2114 = vmatpush1.bf16.msra.mxu0 %v2964_v14  ;;  %2015 = vmatprep.subr.bf16.mxu1 %v2969_v15  ;;  %v3059_v14 = vld [vmem:[#allocation3 + $0x6cc] ss:$24 sps:$4 sm:$0xff]  }
 0x109   : > { %2115 = vmatprep.subr.bf16.mxu0 %v2972_v16  ;;  %v3062_v15 = vld [vmem:[#allocation3 + $0x524] ss:$24 sps:$4 sm:$0xff]   ;;  %v3057_v16 = vld [vmem:[#allocation3 + $0x6c8] ss:$24 sps:$4 sm:$0xff]  }
 0x10b   : > { %2016 = vmatpush1.bf16.msra.mxu1 %v2967_v17  ;;  %v3060_v17 = vld [vmem:[#allocation3 + $0x520] ss:$24 sps:$4 sm:$0xff]  }
 0x10c   : > { %2116 = vmatpush1.bf16.msra.mxu0 %v2970_v18  ;;  %2017 = vmatprep.subr.bf16.mxu1 %v2975_v19  ;;  %v3065_v18 = vld [vmem:[#allocation3 + $0x6fc] ss:$24 sps:$4 sm:$0xff]  }
 0x10d   : > { %2117 = vmatprep.subr.bf16.mxu0 %v2978_v20  ;;  %v3068_v19 = vld [vmem:[#allocation3 + $0x554] ss:$24 sps:$4 sm:$0xff]   ;;  %v3063_v20 = vld [vmem:[#allocation3 + $0x6f8] ss:$24 sps:$4 sm:$0xff]  }
 0x10f   : > { %2018 = vmatpush1.bf16.msra.mxu1 %v2973_v21  ;;  %v3066_v21 = vld [vmem:[#allocation3 + $0x550] ss:$24 sps:$4 sm:$0xff]  }
 0x110   : > { %2118 = vmatpush1.bf16.msra.mxu0 %v2976_v22  ;;  %2019 = vmatprep.subr.bf16.mxu1 %v2981_v23  ;;  %v3071_v22 = vld [vmem:[#allocation3 + $0x72c] ss:$24 sps:$4 sm:$0xff]  }
 0x111   : > { %2119 = vmatprep.subr.bf16.mxu0 %v2984_v24  ;;  %v3074_v23 = vld [vmem:[#allocation3 + $0x584] ss:$24 sps:$4 sm:$0xff]   ;;  %v3069_v24 = vld [vmem:[#allocation3 + $0x728] ss:$24 sps:$4 sm:$0xff]  }
 0x113   : > { %2020 = vmatpush1.bf16.msra.mxu1 %v2979_v25  ;;  %v3072_v25 = vld [vmem:[#allocation3 + $0x580] ss:$24 sps:$4 sm:$0xff]  }
 0x114   : > { %2120 = vmatpush1.bf16.msra.mxu0 %v2982_v26  ;;  %2021 = vmatprep.subr.bf16.mxu1 %v2987_v27  ;;  %v3077_v26 = vld [vmem:[#allocation3 + $0x75c] ss:$24 sps:$4 sm:$0xff]  }
 0x115   : > { %2121 = vmatprep.subr.bf16.mxu0 %v2990_v28  ;;  %v3080_v27 = vld [vmem:[#allocation3 + $0x5b4] ss:$24 sps:$4 sm:$0xff]   ;;  %v3075_v28 = vld [vmem:[#allocation3 + $0x758] ss:$24 sps:$4 sm:$0xff]  }
 0x117   : > { %2022 = vmatpush1.bf16.msra.mxu1 %v2985_v29  ;;  %v3078_v29 = vld [vmem:[#allocation3 + $0x5b0] ss:$24 sps:$4 sm:$0xff]  }
 0x118   : > { %2122 = vmatpush1.bf16.msra.mxu0 %v2988_v30  ;;  %2023 = vmatprep.subr.bf16.mxu1 %v2993_v31  ;;  %v3083_v30 = vld [vmem:[#allocation3 + $0x5e4] ss:$24 sps:$4 sm:$0xff]   ;;  %v3081_v31 = vld [vmem:[#allocation3 + $0x5e0] ss:$24 sps:$4 sm:$0xff]  }
 0x119   : > { %2134 = vmatprep.subr.bf16.mxu0 %v2996_v32  ;;  %v3086_v32 = vld [vmem:[#allocation3 + $0x614] ss:$24 sps:$4 sm:$0xff]  }
 0x11b   : > { %2024 = vmatpush1.bf16.msra.mxu1 %v2991_v33  ;;  %2124 = vmatmul.mubr.bf16.vlgmr.msra.gmra.mrb[4].mxu0 %v3306_v63  ;;  %v3033_v63 = vld [vmem:[#allocation3 + $0x608] ss:$24 sps:$4 sm:$0xff]  }
 0x11c   : > { %2135 = vmatpush1.bf16.msra.mxu0 %v2994_v34  ;;  %2166 = vmatprep.mubr.bf16.mxu0 %v3297_v58  ;;  %v3020_v58 = vld [vmem:[#allocation3 + $0x3d4] ss:$24 sps:$4 sm:$0xff]   ;;  %v3084_v33 = vld [vmem:[#allocation3 + $0x610] ss:$24 sps:$4 sm:$0xff]   ;;  %v3089_v34 = vld [vmem:[#allocation3 + $0x644] ss:$24 sps:$4 sm:$0xff]  }
 0x11d   : > { %2025 = vmatprep.subr.bf16.mxu1 %v2999_v35  ;;  %2136 = vmatprep.subr.bf16.mxu0 %v3002_v36  ;;  %v3087_v35 = vld [vmem:[#allocation3 + $0x640] ss:$24 sps:$4 sm:$0xff]   ;;  %v3092_v36 = vld [vmem:[#allocation3 + $0x674] ss:$24 sps:$4 sm:$0xff]  }
 0x11f   : > { %2026 = vmatpush1.bf16.msra.mxu1 %v2997_v37  ;;  %v3090_v37 = vld [vmem:[#allocation3 + $0x670] ss:$24 sps:$4 sm:$0xff]  }
 0x120   : > { %2137 = vmatpush1.bf16.msra.mxu0 %v3000_v38  ;;  %2027 = vmatprep.subr.bf16.mxu1 %v3005_v39  ;;  %v3095_v38 = vld [vmem:[#allocation3 + $0x6a4] ss:$24 sps:$4 sm:$0xff]   ;;  %v3093_v39 = vld [vmem:[#allocation3 + $0x6a0] ss:$24 sps:$4 sm:$0xff]  }
 0x121   : > { %2138 = vmatprep.subr.bf16.mxu0 %v3008_v40  ;;  %v3098_v40 = vld [vmem:[#allocation3 + $0x6d4] ss:$24 sps:$4 sm:$0xff]  }
 0x123   : > { %2028 = vmatpush1.bf16.msra.mxu1 %v3003_v41  ;;  %v3096_v41 = vld [vmem:[#allocation3 + $0x6d0] ss:$24 sps:$4 sm:$0xff]  }
 0x124   : > { %2139 = vmatpush1.bf16.msra.mxu0 %v3006_v42  ;;  %2029 = vmatprep.subr.bf16.mxu1 %v3011_v43  ;;  %v3101_v42 = vld [vmem:[#allocation3 + $0x704] ss:$24 sps:$4 sm:$0xff]   ;;  %v3104_v43 = vld [vmem:[#allocation3 + $0x734] ss:$24 sps:$4 sm:$0xff]  }
 0x125   : > { %2140 = vmatprep.subr.bf16.mxu0 %v3014_v44  ;;  %v3107_v44 = vld [vmem:[#allocation3 + $0x764] ss:$24 sps:$4 sm:$0xff]  }
 0x127   : > { %2030 = vmatpush1.bf16.msra.mxu1 %v3009_v45  ;;  %v3105_v45 = vld [vmem:[#allocation3 + $0x760] ss:$24 sps:$4 sm:$0xff]  }
 0x128   : > { %2141 = vmatpush1.bf16.msra.mxu0 %v3012_v46  ;;  %2031 = vmatprep.subr.bf16.mxu1 %v3017_v47 }
 0x129   : > { %2142 = vmatprep.subr.bf16.mxu0 %v3020_v58 }
 0x12b   : > { %2032 = vmatpush1.bf16.msra.mxu1 %v3015_v48 }
 0x12c   : > { %2143 = vmatpush1.bf16.msra.mxu0 %v3018_v49  ;;  %2033 = vmatprep.subr.bf16.mxu1 %v3023_v50 }
 0x12d   : > { %2144 = vmatprep.subr.bf16.mxu0 %v3026_v51 }
 0x12f   : > { %2034 = vmatpush1.bf16.msra.mxu1 %v3021_v52 }
 0x130   : > { %2145 = vmatpush1.bf16.msra.mxu0 %v3024_v53  ;;  %2035 = vmatprep.subr.bf16.mxu1 %v3029_v54 }
 0x131   : > { %2146 = vmatprep.subr.bf16.mxu0 %v3032_v55 }
 0x133   : > { %2036 = vmatpush1.bf16.msra.mxu1 %v3027_v57 }
 0x134   : > { %2147 = vmatpush1.bf16.msra.mxu0 %v3030_v59  ;;  %2048 = vmatprep.subr.bf16.mxu1 %v3035_v60 }
 0x135   : > { %2148 = vmatprep.subr.bf16.mxu0 %v3038_v61 }
 0x136   : > { %2038 = vmatmul.mubr.bf16.vlgmr.msra.gmra.mrb[4].mxu1 %v3300_v62 }
 0x137   : > { %2049 = vmatpush1.bf16.msra.mxu1 %v3033_v63  ;;  %2080 = vmatprep.mubr.bf16.mxu1 %v3183_v3 }
 0x138   : > { %2149 = vmatpush1.bf16.msra.mxu0 %v3036_v0  ;;  %2050 = vmatprep.subr.bf16.mxu1 %v3041_v1 }
 0x139   : > { %2150 = vmatprep.subr.bf16.mxu0 %v3044_v2 }
 0x13b   : > { %2051 = vmatpush1.bf16.msra.mxu1 %v3039_v4 }
 0x13c   : > { %2151 = vmatpush1.bf16.msra.mxu0 %v3042_v5  ;;  %2052 = vmatprep.subr.bf16.mxu1 %v3047_v6 }
 0x13d   : > { %2152 = vmatprep.subr.bf16.mxu0 %v3050_v7 }
 0x13f   : > { %2053 = vmatpush1.bf16.msra.mxu1 %v3045_v8 }
 0x140   : > { %2153 = vmatpush1.bf16.msra.mxu0 %v3048_v9  ;;  %2054 = vmatprep.subr.bf16.mxu1 %v3053_v10 }
 0x141   : > { %2154 = vmatprep.subr.bf16.mxu0 %v3056_v11 }
 0x143   : > { %2055 = vmatpush1.bf16.msra.mxu1 %v3051_v12 }
 0x144   : > { %2155 = vmatpush1.bf16.msra.mxu0 %v3054_v13  ;;  %2056 = vmatprep.subr.bf16.mxu1 %v3059_v14 }
 0x145   : > { %2156 = vmatprep.subr.bf16.mxu0 %v3062_v15 }
 0x147   : > { %2057 = vmatpush1.bf16.msra.mxu1 %v3057_v16 }
 0x148   : > { %2157 = vmatpush1.bf16.msra.mxu0 %v3060_v17  ;;  %2058 = vmatprep.subr.bf16.mxu1 %v3065_v18 }
 0x149   : > { %2158 = vmatprep.subr.bf16.mxu0 %v3068_v19 }
 0x14b   : > { %2059 = vmatpush1.bf16.msra.mxu1 %v3063_v20 }
 0x14c   : > { %2159 = vmatpush1.bf16.msra.mxu0 %v3066_v21  ;;  %2060 = vmatprep.subr.bf16.mxu1 %v3071_v22 }
 0x14d   : > { %2160 = vmatprep.subr.bf16.mxu0 %v3074_v23 }
 0x14f   : > { %2061 = vmatpush1.bf16.msra.mxu1 %v3069_v24 }
 0x150   : > { %2161 = vmatpush1.bf16.msra.mxu0 %v3072_v25  ;;  %2062 = vmatprep.subr.bf16.mxu1 %v3077_v26 }
 0x151   : > { %2162 = vmatprep.subr.bf16.mxu0 %v3080_v27 }
 0x153   : > { %2063 = vmatpush1.bf16.msra.mxu1 %v3075_v28 }
 0x154   : > { %2163 = vmatpush1.bf16.msra.mxu0 %v3078_v29 }
 0x155   : > { %2164 = vmatprep.subr.bf16.mxu0 %v3083_v30 }
 0x156   : > { %2081 = vmatmul.mubr.bf16.vlgmr.msra.gmra.mrb[4].mxu1 %v3292_v56 }
 0x158   : > { %2165 = vmatpush1.bf16.msra.mxu0 %v3081_v31 }
 0x159   : > { %2177 = vmatprep.subr.bf16.mxu0 %v3086_v32 }
 0x15b   : > { %2167 = vmatmul.mubr.bf16.vlgmr.msra.gmra.mrb[4].mxu0 %v3300_v62  ;;  %v3099_v62 = vld [vmem:[#allocation3 + $0x700] ss:$24 sps:$4 sm:$0xff]  }
 0x15c   : > { %2178 = vmatpush1.bf16.msra.mxu0 %v3084_v33  ;;  %2209 = vmatprep.mubr.bf16.mxu0 %v3183_v3  ;;  %v3102_v3 = vld [vmem:[#allocation3 + $0x730] ss:$24 sps:$4 sm:$0xff]  }
 0x15d   : > { %2179 = vmatprep.subr.bf16.mxu0 %v3089_v34 }
 0x160   : > { %2180 = vmatpush1.bf16.msra.mxu0 %v3087_v35 }
 0x161   : > { %2181 = vmatprep.subr.bf16.mxu0 %v3092_v36 }
 0x164   : > { %2182 = vmatpush1.bf16.msra.mxu0 %v3090_v37 }
 0x165   : > { %2183 = vmatprep.subr.bf16.mxu0 %v3095_v38 }
 0x168   : > { %2184 = vmatpush1.bf16.msra.mxu0 %v3093_v39 }
 0x169   : > { %2185 = vmatprep.subr.bf16.mxu0 %v3098_v40 }
 0x16c   : > { %2186 = vmatpush1.bf16.msra.mxu0 %v3096_v41 }
 0x16d   : > { %2187 = vmatprep.subr.bf16.mxu0 %v3101_v42 }
 0x170   : > { %2188 = vmatpush1.bf16.msra.mxu0 %v3099_v62 }
 0x171   : > { %2189 = vmatprep.subr.bf16.mxu0 %v3104_v43 }
 0x174   : > { %2190 = vmatpush1.bf16.msra.mxu0 %v3102_v3 }
 0x175   : > { %2191 = vmatprep.subr.bf16.mxu0 %v3107_v44 }
 0x178   : > { %2192 = vmatpush1.bf16.msra.mxu0 %v3105_v45 }
 0x17b   : > { %2210 = vmatmul.mubr.bf16.vlgmr.msra.gmra.mrb[4].mxu0 %v3292_v56 }
 0x189   : > { %v1867_v46 = vpop.f32.mrb[0].mxu1 }
 0x18a   : > { %v1869_v47 = vpop.f32.mrb[1].mxu1 }
 0x18b   : > { %v1871_v58 = vpop.f32.mrb[2].mxu1 }
 0x18c   : > { %v1873_v48 = vpop.f32.mrb[3].mxu1 }
 0x1ae   : > { %v1953_v49 = vpop.f32.mrb[0].mxu0 }
 0x1af   : > { %v2677_v50 = vadd.f32 %v1953_v49, %v1867_v46  ;;  %v1955_v51 = vpop.f32.mrb[1].mxu0 }
 0x1b0   : > { %v2678_v52 = vadd.f32 %v1955_v51, %v1869_v47  ;;  %v1957_v53 = vpop.f32.mrb[2].mxu0 }
 0x1b1   : > { %v2679_v54 = vadd.f32 %v1957_v53, %v1871_v58  ;;  %v1959_v55 = vpop.f32.mrb[3].mxu0  ;;  %v2220_v61 = vmul.f32 %v2677_v50, %v2677_v50 }
 0x1b2   : > { %v2680_v57 = vadd.f32 %v1959_v55, %v1873_v48  ;;  %v2221_v17 = vmul.f32 %v2678_v52, %v2678_v52 }
 0x1b3   : > { %v2223_v4 = vmul.f32 %v2679_v54, %v2679_v54 }
 0x1b4   : > { %v2224_v28 = vmul.f32 %v2680_v57, %v2680_v57 }
 0x229   : > { %v2082_v59 = vpop.f32.mrb[4].mxu1 }
 0x22a   : > { %v2084_v60 = vpop.f32.mrb[5].mxu1  ;;  %v2222_v20 = vmul.f32 %v2082_v59, %v2082_v59 }
 0x22b   : > { %v2226_v63 = vmul.f32 %v2084_v60, %v2084_v60  ;;  %v2086_v0 = vpop.f32.mrb[6].mxu1 }
 0x22c   : > { %v2088_v1 = vpop.f32.mrb[7].mxu1  ;;  %v2225_v29 = vmul.f32 %v2086_v0, %v2086_v0 }
 0x22d   : > { %v2232_v56 = vadd.f32 %v2226_v63, %v2220_v61  ;;  %v2229_v2 = vmul.f32 %v2088_v1, %v2088_v1 }
 0x22f   : > { %3108 = vrsqrt.f32 %v2232_v56  ;;  %v2235_v5 = vadd.f32 %v2229_v2, %v2223_v4  ;;  %vm2240_vm9 = vcmp.eq.f32.partialorder %v2232_v56, inf  ;;  %v2243_v8 = vand.u32 2147483648, %v2232_v56 }
 0x230   : > { %vm2242_vm10 = vcmp.eq.f32.partialorder %v2232_v56, 0.0 }
 0x231   : > { %3110 = vrsqrt.f32 %v2235_v5  ;;  %vm2261_vm11 = vcmp.eq.f32.partialorder %v2235_v5, inf  ;;  %v2264_v13 = vand.u32 2147483648, %v2235_v5  ;;  %vm2263_vm12 = vcmp.eq.f32.partialorder %v2235_v5, 0.0 }
 0x239   : > { %v3109_v6 = vpop.eup %3108 }
 0x23a   : > { %v2239_v7 = vmul.f32 %v3109_v6, %v2232_v56 }
 0x23b   : > { %v3111_v9 = vpop.eup %3110 }
 0x23c   : > { %v2241_v10 = vsel %vm2240_vm9, %v2232_v56, %v2239_v7  ;;  %v2260_v12 = vmul.f32 %v3111_v9, %v2235_v5 }
 0x23d   : > { %v2244_v11 = vsel %vm2242_vm10, %v2243_v8, %v2241_v10 }
 0x23e   : > { %2280 = vst [vmem:[%s3322_s25] sm:$0xff] %v2244_v11  ;;  %v2262_v14 = vsel %vm2261_vm11, %v2235_v5, %v2260_v12 }
 0x23f   : > { %v2265_v15 = vsel %vm2263_vm12, %v2264_v13, %v2262_v14 }
 0x240   : > { %2283 = vst [vmem:[%s3322_s25 + $0x18] sm:$0xff] %v2265_v15 }
 0x24e   : > { %v2211_v16 = vpop.f32.mrb[4].mxu0 }
 0x24f   : > { %v2227_v18 = vmul.f32 %v2211_v16, %v2211_v16  ;;  %v2213_v19 = vpop.f32.mrb[5].mxu0 }
 0x250   : > { %v2228_v21 = vmul.f32 %v2213_v19, %v2213_v19  ;;  %v2215_v22 = vpop.f32.mrb[6].mxu0 }
 0x251   : > { %v2233_v23 = vadd.f32 %v2227_v18, %v2221_v17  ;;  %v2230_v24 = vmul.f32 %v2215_v22, %v2215_v22  ;;  %v2217_v25 = vpop.f32.mrb[7].mxu0 }
 0x252   : > { %v2234_v26 = vadd.f32 %v2228_v21, %v2222_v20  ;;  %v2231_v27 = vmul.f32 %v2217_v25, %v2217_v25 }
 0x253   : > { %3112 = vrsqrt.f32 %v2233_v23  ;;  %v2236_v30 = vadd.f32 %v2230_v24, %v2224_v28  ;;  %vm2247_vm13 = vcmp.eq.f32.partialorder %v2233_v23, inf  ;;  %v2250_v35 = vand.u32 2147483648, %v2233_v23 }
 0x254   : > { %3114 = vrsqrt.f32 %v2234_v26  ;;  %v2237_v31 = vadd.f32 %v2231_v27, %v2225_v29  ;;  %vm2249_vm14 = vcmp.eq.f32.partialorder %v2233_v23, 0.0  ;;  %vm2254_vm15 = vcmp.eq.f32.partialorder %v2234_v26, inf }
 0x255   : > { %3116 = vrsqrt.f32 %v2236_v30  ;;  %v2257_v38 = vand.u32 2147483648, %v2234_v26  ;;  %vm2256_vm0 = vcmp.eq.f32.partialorder %v2234_v26, 0.0  ;;  %vm2268_vm1 = vcmp.eq.f32.partialorder %v2236_v30, inf }
 0x256   : > { %3118 = vrsqrt.f32 %v2237_v31  ;;  %v2271_v3 = vand.u32 2147483648, %v2236_v30  ;;  %vm2270_vm2 = vcmp.eq.f32.partialorder %v2236_v30, 0.0  ;;  %vm2275_vm3 = vcmp.eq.f32.partialorder %v2237_v31, inf }
 0x257   : > { %v2278_v46 = vand.u32 2147483648, %v2237_v31  ;;  %vm2277_vm4 = vcmp.eq.f32.partialorder %v2237_v31, 0.0 }
 0x25d   : > { %v3113_v32 = vpop.eup %3112 }
 0x25e   : > { %v3115_v33 = vpop.eup %3114  ;;  %v2246_v34 = vmul.f32 %v3113_v32, %v2233_v23 }
 0x25f   : > { %v2253_v36 = vmul.f32 %v3115_v33, %v2234_v26  ;;  %v3117_v39 = vpop.eup %3116 }
 0x260   : > { %v2248_v37 = vsel %vm2247_vm13, %v2233_v23, %v2246_v34  ;;  %v3119_v42 = vpop.eup %3118  ;;  %v2267_v43 = vmul.f32 %v3117_v39, %v2236_v30 }
 0x261   : > { %v2251_v40 = vsel %vm2249_vm14, %v2250_v35, %v2248_v37  ;;  %v2255_v41 = vsel %vm2254_vm15, %v2234_v26, %v2253_v36  ;;  %v2274_v44 = vmul.f32 %v3119_v42, %v2237_v31 }
 0x262   : > { %2281 = vst [vmem:[%s3322_s25 + $0x8] sm:$0xff] %v2251_v40  ;;  %v2258_v62 = vsel %vm2256_vm0, %v2257_v38, %v2255_v41  ;;  %v2269_v45 = vsel %vm2268_vm1, %v2236_v30, %v2267_v43 }
 0x263   : > { %2282 = vst [vmem:[%s3322_s25 + $0x10] sm:$0xff] %v2258_v62  ;;  %v2272_v47 = vsel %vm2270_vm2, %v2271_v3, %v2269_v45  ;;  %v2276_v58 = vsel %vm2275_vm3, %v2237_v31, %v2274_v44 }
 0x264   : > { %2284 = vst [vmem:[%s3322_s25 + $0x20] sm:$0xff] %v2272_v47  ;;  %v2279_v48 = vsel %vm2277_vm4, %v2278_v46, %v2276_v58 }
 0x265   : > { %2285 = vst [vmem:[%s3322_s25 + $0x28] sm:$0xff] %v2279_v48 }
 0x266 PF: > { %s14_s14 = sadd.s32 1, %s3175_s14   ;;  %s3351_s12 = smov %s3171_s13 }
 0x267   : > { %p11_p4 = scmp.ge.s32.totalorder %s14_s14, 4   ;;  %s3352_s13 = smov %s3354_s16 }
 0x269   :  { %13 = sbr.rel (!%p11_p4) target bundleno = 2 (0x2), region = 70 }
 0x270   :  { %2318 = vsyncpa [#allocation4], 1 }
 0x271   :  { %2320 = vsyncpa [#allocation4 + $0x1], 1 }

</bundles_post_ra>
